<compile_context>
chip_gen: v5e
topology: v5e:2x2
jax: 0.10.0
libtpu: 0.0.40
codegen_flags: <defaults>
</compile_context>

<pallas_src>
import functools

import jax
import jax.numpy as jnp
from jax.experimental import pallas as pl
from jax.experimental.pallas import tpu as pltpu


def _linear_clip_kernel(x_ref, w_ref, o_ref, *, normalize: bool):
    # x_ref: (TB, in_dim)   w_ref: (in_dim, embed_dim)   o_ref: (TB, embed_dim)
    # W already has the contraction axis leading, so the MXU stationary operand
    # needs no per-step transpose; accumulate in f32 regardless of input dtype.
    y = jnp.dot(x_ref[...], w_ref[...], preferred_element_type=jnp.float32)
    if normalize:
        # F.normalize(dim=-1): y / max(||y||_2, eps), eps = 1e-12.
        # rsqrt(max(sumsq, eps^2)) == 1 / max(||y||, eps)  (sqrt is monotonic).
        eps = jnp.float32(1e-12)
        sumsq = jnp.sum(y * y, axis=-1, keepdims=True)
        y = y * jax.lax.rsqrt(jnp.maximum(sumsq, eps * eps))
    o_ref[...] = y.astype(o_ref.dtype)


def _round_up(x: int, m: int) -> int:
    return ((x + m - 1) // m) * m


def _choose_batch_tile(B: int, itemsize: int, block_b) -> int:
    """Pick the batch-tile size (rows per grid step)."""
    if block_b is None:
        # HBM-bound: big tiles amortize per-step pipeline overhead.
        # 2048 rows for 4-byte dtypes, 4096 for bf16, capped below scoped VMEM.
        block_b = max(512, 8192 // max(itemsize, 1))
    # Minimum sublane granularity for this dtype (f32:8, bf16:16, int8/fp8:32).
    sub = 8 * max(1, 4 // max(itemsize, 1))
    tb = min(block_b, B)
    # v7x megacore: keep >= 2 grid steps per TensorCore (grid >= 4) so DMA
    # prefetch overlaps compute on both cores; never shrink a step below 256
    # rows (fixed per-step overhead would dominate). Measured-neutral on
    # single-TC v5e/v6e.
    if B >= 4 * 256:
        tb = min(tb, max(256, _round_up(pl.cdiv(B, 4), sub)))
    return tb


def linear_for_clip(
    text_emb: jax.Array,
    weight: jax.Array,
    normalize: bool = False,
    *,
    block_b: int | None = None,
    out_dtype=None,
):
    """text_emb: (B, in_dim); weight: (embed_dim, in_dim) -- nn.Linear.weight layout."""
    B, in_dim = text_emb.shape
    embed_dim, in_dim_w = weight.shape
    assert in_dim == in_dim_w, "weight must be (embed_dim, in_dim)"
    out_dtype = text_emb.dtype if out_dtype is None else jnp.dtype(out_dtype)

    x_itemsize = jnp.dtype(text_emb.dtype).itemsize
    w_itemsize = jnp.dtype(weight.dtype).itemsize
    o_itemsize = jnp.dtype(out_dtype).itemsize

    tb = _choose_batch_tile(B, x_itemsize, block_b)
    grid_b = pl.cdiv(B, tb)

    # One tiny (embed_dim, in_dim) -> (in_dim, embed_dim) layout op per call;
    # this is layout plumbing (done once), not per-grid-step work.
    w_t = weight.T

    # Explicit scoped-VMEM budget: double-buffered x/out tiles + (possibly
    # double-buffered) resident W + f32 matmul result / epilogue temporaries.
    tile_bytes = 2 * tb * (in_dim * x_itemsize + embed_dim * o_itemsize)
    w_bytes = 2 * in_dim * embed_dim * w_itemsize
    acc_bytes = 2 * tb * embed_dim * 4
    vmem_limit = max(32 * 1024 * 1024, int(1.25 * (tile_bytes + w_bytes + acc_bytes)))

    cost = pl.CostEstimate(
        flops=2 * B * in_dim * embed_dim,
        transcendentals=B if normalize else 0,
        bytes_accessed=(
            text_emb.size * x_itemsize
            + weight.size * w_itemsize
            + B * embed_dim * o_itemsize
        ),
    )

    kernel = functools.partial(_linear_clip_kernel, normalize=normalize)

    def _call(w_pipeline_mode):
        if w_pipeline_mode is None:
            w_spec = pl.BlockSpec((in_dim, embed_dim), lambda i: (0, 0))
        else:
            # Constant index_map -> W is fetched once and stays resident across
            # the whole grid; a single buffer is enough, freeing VMEM for the
            # larger x/out tiles.
            w_spec = pl.BlockSpec(
                (in_dim, embed_dim), lambda i: (0, 0), pipeline_mode=w_pipeline_mode
            )
        return pl.pallas_call(
            kernel,
            out_shape=jax.ShapeDtypeStruct((B, embed_dim), out_dtype),
            grid_spec=pltpu.PrefetchScalarGridSpec(
                num_scalar_prefetch=0,
                grid=(grid_b,),
                in_specs=[
                    # x: tiled along B, auto double-buffered by Pallas.
                    pl.BlockSpec((tb, in_dim), lambda i: (i, 0)),
                    # W: same block every step -> resident in VMEM.
                    w_spec,
                ],
                out_specs=pl.BlockSpec((tb, embed_dim), lambda i: (i, 0)),
            ),
            compiler_params=pltpu.CompilerParams(
                # B tiles independent -> shard across v7x's two TensorCores.
                dimension_semantics=("parallel",),
                # v5e scoped-VMEM default is only 16 MiB; raise explicitly.
                vmem_limit_bytes=vmem_limit,
            ),
            cost_estimate=cost,
        )(text_emb, w_t)

    buffered = getattr(pl, "Buffered", None)
    if buffered is None:
        return _call(None)
    try:
        return _call(buffered(1))
    except Exception:
        # Fallback if this jax version rejects a single-buffer pipeline for
        # pallas_call; costs ~0.5 MiB VMEM (double-buffered W), otherwise same.
        return _call(None)


def _reference(text_emb, weight, normalize):
    y = text_emb.astype(jnp.float32) @ weight.astype(jnp.float32).T
    if normalize:
        n = jnp.sqrt(jnp.sum(y * y, axis=-1, keepdims=True))
        y = y / jnp.maximum(n, 1e-12)
    return y


if __name__ == "__main__":
    key = jax.random.PRNGKey(0)
    k_x, k_w, k_x2 = jax.random.split(key, 3)

    in_dim = 512       # fixed by the module
    embed_dim = 256    # default embed_dim

    # Deterministic init mimicking nn.Linear's uniform(-1/sqrt(in), 1/sqrt(in)).
    bound = 1.0 / jnp.sqrt(jnp.float32(in_dim))
    weight = jax.random.uniform(
        k_w, (embed_dim, in_dim), dtype=jnp.float32, minval=-bound, maxval=bound
    )

    # Small shape consistent with the module (single block, grid=(1,)).
    B_small = 8
    x_small = jax.random.normal(k_x, (B_small, in_dim), dtype=jnp.float32)

    out = linear_for_clip(x_small, weight, normalize=False)
    out_norm = linear_for_clip(x_small, weight, normalize=True)
    jax.block_until_ready((out, out_norm))

    assert jnp.allclose(out.astype(jnp.float32),
                        _reference(x_small, weight, False), atol=1e-4, rtol=1e-4)
    assert jnp.allclose(out_norm.astype(jnp.float32),
                        _reference(x_small, weight, True), atol=1e-4, rtol=1e-4)

    # Mid-size batch with a ragged tail: exercises the tiled/pipelined path
    # (grid >= 4 so both v7x TensorCores get >= 2 steps to overlap DMA/compute).
    B_big = 1100
    x_big = jax.random.normal(k_x2, (B_big, in_dim), dtype=jnp.float32)
    out_big = linear_for_clip(x_big, weight, normalize=True)
    jax.block_until_ready(out_big)
    assert jnp.allclose(out_big.astype(jnp.float32),
                        _reference(x_big, weight, True), atol=1e-4, rtol=1e-4)

    # bf16 I/O path: halves HBM traffic for x/out; accumulation stays f32.
    x_bf16 = x_big.astype(jnp.bfloat16)
    w_bf16 = weight.astype(jnp.bfloat16)
    out_bf16 = linear_for_clip(x_bf16, w_bf16, normalize=True)
    jax.block_until_ready(out_bf16)
    assert jnp.allclose(out_bf16.astype(jnp.float32),
                        _reference(x_bf16, w_bf16, True), atol=2e-2, rtol=2e-2)

    print("KERNEL_OK")
</pallas_src>

<mosaic_0001>
module attributes {stable_mosaic.version = 11 : i64} {
  func.func @_linear_clip_kernel(%arg0: i32, %arg1: memref<8x512xf32, #tpu.memory_space<vmem>>, %arg2: memref<512x256xf32, #tpu.memory_space<vmem>>, %arg3: memref<8x256xf32, #tpu.memory_space<vmem>>) attributes {dimension_semantics = [#tpu.dimension_semantics<parallel>], iteration_bounds = array<i64: 1>, scalar_prefetch = 0 : i64, scratch_operands = 0 : i64, tpu.core_type = #tpu.core_type<tc>, window_params = [{transform_indices = @transform_0, window_bounds = array<i64: 8, 512>}, {pipeline_mode = #tpu.pipeline_mode<synchronous>, transform_indices = @transform_1, window_bounds = array<i64: 512, 256>}, {transform_indices = @transform_2, window_bounds = array<i64: 8, 256>}]} {
    %c0 = arith.constant 0 : index
    %c0_0 = arith.constant 0 : index
    %0 = vector.load %arg1[%c0, %c0_0] : memref<8x512xf32, #tpu.memory_space<vmem>>, vector<8x512xf32>
    %c0_1 = arith.constant 0 : index
    %c0_2 = arith.constant 0 : index
    %1 = vector.load %arg2[%c0_1, %c0_2] : memref<512x256xf32, #tpu.memory_space<vmem>>, vector<512x256xf32>
    %cst = arith.constant dense<0.000000e+00> : vector<8x256xf32>
    %2 = tpu.matmul %0, %1, %cst {dimension_numbers = #tpu.dot_dimension_numbers<[1], [0], [0], [1], [0, 0, 1, 1], [], []>} : vector<8x512xf32>, vector<512x256xf32>, vector<8x256xf32> -> vector<8x256xf32>
    %c0_3 = arith.constant 0 : index
    %c0_4 = arith.constant 0 : index
    %3 = vector.load %arg3[%c0_3, %c0_4] : memref<8x256xf32, #tpu.memory_space<vmem>>, vector<8x256xf32>
    tpu.vector_store %arg3[%c0_3, %c0_4], %2 {strides = array<i32>} : memref<8x256xf32, #tpu.memory_space<vmem>>, vector<8x256xf32>,
    return
  }
  func.func @transform_0(%arg0: i32) -> (i32, i32) {
    %c0_i32 = arith.constant 0 : i32
    %c0_i32_0 = arith.constant 0 : i32
    return %arg0, %c0_i32 : i32, i32
  }
  func.func @transform_1(%arg0: i32) -> (i32, i32) {
    %c0_i32 = arith.constant 0 : i32
    %c0_i32_0 = arith.constant 0 : i32
    %c0_i32_1 = arith.constant 0 : i32
    return %c0_i32, %c0_i32_0 : i32, i32
  }
  func.func @transform_2(%arg0: i32) -> (i32, i32) {
    %c0_i32 = arith.constant 0 : i32
    %c0_i32_0 = arith.constant 0 : i32
    return %arg0, %c0_i32 : i32, i32
  }
}

module attributes {stable_mosaic.version = 11 : i64} {
  func.func @_linear_clip_kernel(%arg0: i32, %arg1: memref<8x512xf32, #tpu.memory_space<vmem>>, %arg2: memref<512x256xf32, #tpu.memory_space<vmem>>, %arg3: memref<8x256xf32, #tpu.memory_space<vmem>>) attributes {dimension_semantics = [#tpu.dimension_semantics<parallel>], iteration_bounds = array<i64: 1>, scalar_prefetch = 0 : i64, scratch_operands = 0 : i64, tpu.core_type = #tpu.core_type<tc>, window_params = [{transform_indices = @transform_0, window_bounds = array<i64: 8, 512>}, {pipeline_mode = #tpu.pipeline_mode<synchronous>, transform_indices = @transform_1, window_bounds = array<i64: 512, 256>}, {transform_indices = @transform_2, window_bounds = array<i64: 8, 256>}]} {
    %c0 = arith.constant 0 : index
    %c0_0 = arith.constant 0 : index
    %0 = vector.load %arg1[%c0, %c0_0] : memref<8x512xf32, #tpu.memory_space<vmem>>, vector<8x512xf32>
    %c0_1 = arith.constant 0 : index
    %c0_2 = arith.constant 0 : index
    %1 = vector.load %arg2[%c0_1, %c0_2] : memref<512x256xf32, #tpu.memory_space<vmem>>, vector<512x256xf32>
    %cst = arith.constant dense<0.000000e+00> : vector<8x256xf32>
    %2 = tpu.matmul %0, %1, %cst {dimension_numbers = #tpu.dot_dimension_numbers<[1], [0], [0], [1], [0, 0, 1, 1], [], []>} : vector<8x512xf32>, vector<512x256xf32>, vector<8x256xf32> -> vector<8x256xf32>
    %c0_3 = arith.constant 0 : index
    %c0_4 = arith.constant 0 : index
    %3 = vector.load %arg3[%c0_3, %c0_4] : memref<8x256xf32, #tpu.memory_space<vmem>>, vector<8x256xf32>
    tpu.vector_store %arg3[%c0_3, %c0_4], %2 {strides = array<i32>} : memref<8x256xf32, #tpu.memory_space<vmem>>, vector<8x256xf32>,
    return
  }
  func.func @transform_0(%arg0: i32) -> (i32, i32) {
    %c0_i32 = arith.constant 0 : i32
    %c0_i32_0 = arith.constant 0 : i32
    return %arg0, %c0_i32 : i32, i32
  }
  func.func @transform_1(%arg0: i32) -> (i32, i32) {
    %c0_i32 = arith.constant 0 : i32
    %c0_i32_0 = arith.constant 0 : i32
    %c0_i32_1 = arith.constant 0 : i32
    return %c0_i32, %c0_i32_0 : i32, i32
  }
  func.func @transform_2(%arg0: i32) -> (i32, i32) {
    %c0_i32 = arith.constant 0 : i32
    %c0_i32_0 = arith.constant 0 : i32
    return %arg0, %c0_i32 : i32, i32
  }
}

</mosaic_0001>

<bundles_post_ra>
// kernel: tpu_custom_call.1
= control target key start
LH: loop header
LB: loop body
LE: loop exit
PB: predicated region body
PF: predicated region fallthrough
CT: control target
= control target key end

     0   :  { %7 = vsyncpa [#allocation3], 0  ;;  %s466_s0 = inlined_call_operand.hbm [shape: f32[8,512], index: 0, kind: input, shape index: {}]   ;;  %s467_s1 = inlined_call_operand.hbm [shape: f32[512,256], index: 1, kind: input, shape index: {}]   ;;  %s468_s2 = inlined_call_operand.hbm [shape: f32[8,256], index: 2, kind: output, shape index: {}]  }
   0x1   :  { %8 = vsyncpa [#allocation6], 0 }
   0x2   :  { %9 = vsyncpa [#allocation4], 0  ;;  %s15_s11 = sshll.u32 %s466_s0, 4  ;;  %s437_s12 = smov [#allocation2]   ;;  %s16_s11 = int_to_ptr.hbm [resolvable:$true] %s15_s11 }
   0x3   :  { %s17_s13 = sshll.u32 %s437_s12, 4  ;;  %s25_s16 = sshll.u32 %s467_s1, 4  ;;  %s18_s13 = int_to_ptr.vmem [resolvable:$true] %s17_s13  ;;  %s26_s16 = int_to_ptr.hbm [resolvable:$true] %s25_s16 }
   0x4   :  { %20 = dma.hbm_to_vmem [thread:$0]  %s16_s11, 512, %s18_s13, [#allocation3]  }
   0x5   :  { %s438_s17 = smov [#allocation5]   ;;  %s439_s19 = smov 256  }
   0x6   :  { %s27_s18 = sshll.u32 %s438_s17, 4  ;;  %s440_s20 = smov 16   ;;  %s28_s18 = int_to_ptr.vmem [resolvable:$true] %s27_s18 }
   0x7   :  { %33 = dma.hbm_to_vmem [thread:$0]  %s26_s16, 16384, %s28_s18, [#allocation6], %s439_s19, %s439_s19, %s440_s20  }
   0x8   :  { %431 = dma.done.wait [#allocation3], 512  }
   0x9   :  { %432 = vsyncadd [#allocation3], 4294966784 }
   0xa   :  { %433 = dma.done.wait [#allocation6], 16384  }
   0xb   :  { %434 = vsyncadd [#allocation6], 4294950912  ;;  %v140_v0 = vld [vmem:[#allocation5 + $0x2f0] sm:$0xff]  ;;  %v138_v1 = vld [vmem:[#allocation5 + $0x2e0] sm:$0xff]  ;;  %s441_s0 = smov [#allocation7]   ;;  %s343_s23 = sshll.u32 %s468_s2, 4  ;;  %s344_s23 = int_to_ptr.hbm [resolvable:$true] %s343_s23 }
   0xc   :  { %v172_v2 = vld [vmem:[#allocation5 + $0x3f0] sm:$0xff]  ;;  %214 = vmatpush.msra.mxu2 %v140_v0  ;;  %v170_v6 = vld [vmem:[#allocation5 + $0x3e0] sm:$0xff]  ;;  %v141_v62 = vld [vmem:[#allocation5 + $0x2f8] sm:$0xff]  ;;  %s341_s1 = sshll.u32 %s441_s0, 4  ;;  %s342_s1 = int_to_ptr.vmem [resolvable:$true] %s341_s1 }
   0xd   :  { %234 = vmatpush.msra.mxu3 %v172_v2  ;;  %v76_v3 = vld [vmem:[#allocation5 + $0xf0] sm:$0xff]  ;;  %v74_v7 = vld [vmem:[#allocation5 + $0xe0] sm:$0xff]  ;;  %v173_v63 = vld [vmem:[#allocation5 + $0x3f8] sm:$0xff] }
   0xe   :  { %v108_v4 = vld [vmem:[#allocation5 + $0x1f0] sm:$0xff]  ;;  %174 = vmatpush.msra.mxu0 %v76_v3  ;;  %v106_v8 = vld [vmem:[#allocation5 + $0x1e0] sm:$0xff]  ;;  %215 = vmatpush.msra.mxu2 %v138_v1  ;;  %v139_v2 = vld [vmem:[#allocation5 + $0x2e8] sm:$0xff] }
   0xf   :  { %v136_v5 = vld [vmem:[#allocation5 + $0x2d0] sm:$0xff]  ;;  %194 = vmatpush.msra.mxu1 %v108_v4  ;;  %235 = vmatpush.msra.mxu3 %v170_v6  ;;  %v134_v11 = vld [vmem:[#allocation5 + $0x2c0] sm:$0xff]  ;;  %v77_v3 = vld [vmem:[#allocation5 + $0xf8] sm:$0xff] }
  0x10   :  { %v168_v9 = vld [vmem:[#allocation5 + $0x3d0] sm:$0xff]  ;;  %175 = vmatpush.msra.mxu0 %v74_v7  ;;  %v166_v13 = vld [vmem:[#allocation5 + $0x3c0] sm:$0xff]  ;;  %216 = vmatpush.msra.mxu2 %v136_v5  ;;  %v109_v4 = vld [vmem:[#allocation5 + $0x1f8] sm:$0xff] }
  0x11   :  { %v72_v10 = vld [vmem:[#allocation5 + $0xd0] sm:$0xff]  ;;  %195 = vmatpush.msra.mxu1 %v106_v8  ;;  %236 = vmatpush.msra.mxu3 %v168_v9  ;;  %v70_v14 = vld [vmem:[#allocation5 + $0xc0] sm:$0xff]  ;;  %v171_v5 = vld [vmem:[#allocation5 + $0x3e8] sm:$0xff] }
  0x12   :  { %v104_v12 = vld [vmem:[#allocation5 + $0x1d0] sm:$0xff]  ;;  %v102_v15 = vld [vmem:[#allocation5 + $0x1c0] sm:$0xff]  ;;  %176 = vmatpush.msra.mxu0 %v72_v10  ;;  %217 = vmatpush.msra.mxu2 %v134_v11  ;;  %v137_v6 = vld [vmem:[#allocation5 + $0x2d8] sm:$0xff] }
  0x13   :  { %196 = vmatpush.msra.mxu1 %v104_v12  ;;  %v132_v16 = vld [vmem:[#allocation5 + $0x2b0] sm:$0xff]  ;;  %237 = vmatpush.msra.mxu3 %v166_v13  ;;  %v130_v20 = vld [vmem:[#allocation5 + $0x2a0] sm:$0xff]  ;;  %v75_v7 = vld [vmem:[#allocation5 + $0xe8] sm:$0xff] }
  0x14   :  { %v164_v17 = vld [vmem:[#allocation5 + $0x3b0] sm:$0xff]  ;;  %177 = vmatpush.msra.mxu0 %v70_v14  ;;  %v162_v21 = vld [vmem:[#allocation5 + $0x3a0] sm:$0xff]  ;;  %218 = vmatpush.msra.mxu2 %v132_v16  ;;  %v107_v8 = vld [vmem:[#allocation5 + $0x1e8] sm:$0xff] }
  0x15   :  { %v68_v18 = vld [vmem:[#allocation5 + $0xb0] sm:$0xff]  ;;  %197 = vmatpush.msra.mxu1 %v102_v15  ;;  %238 = vmatpush.msra.mxu3 %v164_v17  ;;  %v66_v22 = vld [vmem:[#allocation5 + $0xa0] sm:$0xff]  ;;  %v169_v9 = vld [vmem:[#allocation5 + $0x3d8] sm:$0xff] }
  0x16   :  { %v100_v19 = vld [vmem:[#allocation5 + $0x1b0] sm:$0xff]  ;;  %v98_v23 = vld [vmem:[#allocation5 + $0x1a0] sm:$0xff]  ;;  %178 = vmatpush.msra.mxu0 %v68_v18  ;;  %219 = vmatpush.msra.mxu2 %v130_v20  ;;  %v135_v10 = vld [vmem:[#allocation5 + $0x2c8] sm:$0xff] }
  0x17   :  { %198 = vmatpush.msra.mxu1 %v100_v19  ;;  %v128_v24 = vld [vmem:[#allocation5 + $0x290] sm:$0xff]  ;;  %239 = vmatpush.msra.mxu3 %v162_v21  ;;  %v126_v28 = vld [vmem:[#allocation5 + $0x280] sm:$0xff]  ;;  %v73_v11 = vld [vmem:[#allocation5 + $0xd8] sm:$0xff] }
  0x18   :  { %v160_v25 = vld [vmem:[#allocation5 + $0x390] sm:$0xff]  ;;  %179 = vmatpush.msra.mxu0 %v66_v22  ;;  %v158_v29 = vld [vmem:[#allocation5 + $0x380] sm:$0xff]  ;;  %220 = vmatpush.msra.mxu2 %v128_v24  ;;  %v105_v12 = vld [vmem:[#allocation5 + $0x1d8] sm:$0xff] }
  0x19   :  { %v64_v26 = vld [vmem:[#allocation5 + $0x90] sm:$0xff]  ;;  %199 = vmatpush.msra.mxu1 %v98_v23  ;;  %240 = vmatpush.msra.mxu3 %v160_v25  ;;  %v62_v30 = vld [vmem:[#allocation5 + $0x80] sm:$0xff]  ;;  %v167_v13 = vld [vmem:[#allocation5 + $0x3c8] sm:$0xff] }
  0x1a   :  { %v96_v27 = vld [vmem:[#allocation5 + $0x190] sm:$0xff]  ;;  %v94_v31 = vld [vmem:[#allocation5 + $0x180] sm:$0xff]  ;;  %180 = vmatpush.msra.mxu0 %v64_v26  ;;  %221 = vmatpush.msra.mxu2 %v126_v28  ;;  %v133_v14 = vld [vmem:[#allocation5 + $0x2b8] sm:$0xff] }
  0x1b   :  { %200 = vmatpush.msra.mxu1 %v96_v27  ;;  %v124_v32 = vld [vmem:[#allocation5 + $0x270] sm:$0xff]  ;;  %241 = vmatpush.msra.mxu3 %v158_v29  ;;  %v122_v36 = vld [vmem:[#allocation5 + $0x260] sm:$0xff]  ;;  %v71_v15 = vld [vmem:[#allocation5 + $0xc8] sm:$0xff] }
  0x1c   :  { %v156_v33 = vld [vmem:[#allocation5 + $0x370] sm:$0xff]  ;;  %181 = vmatpush.msra.mxu0 %v62_v30  ;;  %v154_v37 = vld [vmem:[#allocation5 + $0x360] sm:$0xff]  ;;  %222 = vmatpush.msra.mxu2 %v124_v32  ;;  %v103_v16 = vld [vmem:[#allocation5 + $0x1c8] sm:$0xff] }
  0x1d   :  { %v60_v34 = vld [vmem:[#allocation5 + $0x70] sm:$0xff]  ;;  %201 = vmatpush.msra.mxu1 %v94_v31  ;;  %242 = vmatpush.msra.mxu3 %v156_v33  ;;  %v58_v38 = vld [vmem:[#allocation5 + $0x60] sm:$0xff]  ;;  %v165_v17 = vld [vmem:[#allocation5 + $0x3b8] sm:$0xff] }
  0x1e   :  { %v92_v35 = vld [vmem:[#allocation5 + $0x170] sm:$0xff]  ;;  %v90_v39 = vld [vmem:[#allocation5 + $0x160] sm:$0xff]  ;;  %182 = vmatpush.msra.mxu0 %v60_v34  ;;  %223 = vmatpush.msra.mxu2 %v122_v36  ;;  %v131_v18 = vld [vmem:[#allocation5 + $0x2a8] sm:$0xff] }
  0x1f   :  { %202 = vmatpush.msra.mxu1 %v92_v35  ;;  %v120_v40 = vld [vmem:[#allocation5 + $0x250] sm:$0xff]  ;;  %243 = vmatpush.msra.mxu3 %v154_v37  ;;  %v118_v44 = vld [vmem:[#allocation5 + $0x240] sm:$0xff]  ;;  %v69_v19 = vld [vmem:[#allocation5 + $0xb8] sm:$0xff] }
  0x20   :  { %v152_v41 = vld [vmem:[#allocation5 + $0x350] sm:$0xff]  ;;  %183 = vmatpush.msra.mxu0 %v58_v38  ;;  %v150_v45 = vld [vmem:[#allocation5 + $0x340] sm:$0xff]  ;;  %224 = vmatpush.msra.mxu2 %v120_v40  ;;  %v101_v20 = vld [vmem:[#allocation5 + $0x1b8] sm:$0xff] }
  0x21   :  { %v56_v42 = vld [vmem:[#allocation5 + $0x50] sm:$0xff]  ;;  %203 = vmatpush.msra.mxu1 %v90_v39  ;;  %244 = vmatpush.msra.mxu3 %v152_v41  ;;  %v54_v46 = vld [vmem:[#allocation5 + $0x40] sm:$0xff]  ;;  %v163_v21 = vld [vmem:[#allocation5 + $0x3a8] sm:$0xff] }
  0x22   :  { %v88_v43 = vld [vmem:[#allocation5 + $0x150] sm:$0xff]  ;;  %v86_v47 = vld [vmem:[#allocation5 + $0x140] sm:$0xff]  ;;  %184 = vmatpush.msra.mxu0 %v56_v42  ;;  %225 = vmatpush.msra.mxu2 %v118_v44  ;;  %v129_v22 = vld [vmem:[#allocation5 + $0x298] sm:$0xff] }
  0x23   :  { %204 = vmatpush.msra.mxu1 %v88_v43  ;;  %v116_v48 = vld [vmem:[#allocation5 + $0x230] sm:$0xff]  ;;  %245 = vmatpush.msra.mxu3 %v150_v45  ;;  %v114_v52 = vld [vmem:[#allocation5 + $0x220] sm:$0xff]  ;;  %v67_v23 = vld [vmem:[#allocation5 + $0xa8] sm:$0xff] }
  0x24   :  { %v148_v49 = vld [vmem:[#allocation5 + $0x330] sm:$0xff]  ;;  %185 = vmatpush.msra.mxu0 %v54_v46  ;;  %v146_v53 = vld [vmem:[#allocation5 + $0x320] sm:$0xff]  ;;  %226 = vmatpush.msra.mxu2 %v116_v48  ;;  %v99_v24 = vld [vmem:[#allocation5 + $0x1a8] sm:$0xff] }
  0x25   :  { %v52_v50 = vld [vmem:[#allocation5 + $0x30] sm:$0xff]  ;;  %205 = vmatpush.msra.mxu1 %v86_v47  ;;  %246 = vmatpush.msra.mxu3 %v148_v49  ;;  %v50_v54 = vld [vmem:[#allocation5 + $0x20] sm:$0xff]  ;;  %v161_v25 = vld [vmem:[#allocation5 + $0x398] sm:$0xff] }
  0x26   :  { %v84_v51 = vld [vmem:[#allocation5 + $0x130] sm:$0xff]  ;;  %v82_v55 = vld [vmem:[#allocation5 + $0x120] sm:$0xff]  ;;  %186 = vmatpush.msra.mxu0 %v52_v50  ;;  %227 = vmatpush.msra.mxu2 %v114_v52  ;;  %v127_v26 = vld [vmem:[#allocation5 + $0x288] sm:$0xff] }
  0x27   :  { %206 = vmatpush.msra.mxu1 %v84_v51  ;;  %v112_v56 = vld [vmem:[#allocation5 + $0x210] sm:$0xff]  ;;  %247 = vmatpush.msra.mxu3 %v146_v53  ;;  %v110_v60 = vld [vmem:[#allocation5 + $0x200] sm:$0xff]  ;;  %v65_v27 = vld [vmem:[#allocation5 + $0x98] sm:$0xff] }
  0x28   :  { %v144_v57 = vld [vmem:[#allocation5 + $0x310] sm:$0xff]  ;;  %187 = vmatpush.msra.mxu0 %v50_v54  ;;  %v142_v61 = vld [vmem:[#allocation5 + $0x300] sm:$0xff]  ;;  %228 = vmatpush.msra.mxu2 %v112_v56  ;;  %v97_v28 = vld [vmem:[#allocation5 + $0x198] sm:$0xff] }
  0x29   :  { %v48_v58 = vld [vmem:[#allocation5 + $0x10] sm:$0xff]  ;;  %207 = vmatpush.msra.mxu1 %v82_v55  ;;  %248 = vmatpush.msra.mxu3 %v144_v57  ;;  %v46_v0 = vld [vmem:[#allocation5] sm:$0xff]  ;;  %v159_v29 = vld [vmem:[#allocation5 + $0x388] sm:$0xff] }
  0x2a   :  { %v80_v59 = vld [vmem:[#allocation5 + $0x110] sm:$0xff]  ;;  %188 = vmatpush.msra.mxu0 %v48_v58  ;;  %v78_v1 = vld [vmem:[#allocation5 + $0x100] sm:$0xff]  ;;  %229 = vmatpush.msra.mxu2 %v110_v60  ;;  %v125_v30 = vld [vmem:[#allocation5 + $0x278] sm:$0xff] }
  0x2b   :  { %208 = vmatpush.msra.mxu1 %v80_v59  ;;  %249 = vmatpush.msra.mxu3 %v142_v61  ;;  %v63_v31 = vld [vmem:[#allocation5 + $0x88] sm:$0xff]  ;;  %v157_v33 = vld [vmem:[#allocation5 + $0x378] sm:$0xff]  ;;  %v44_v44 = vld [vmem:[#allocation2 + $0x10] sm:$0xff] }
  0x2c   :  { %294 = vmatpush.msrb.mxu2 %v141_v62  ;;  %189 = vmatpush.msra.mxu0 %v46_v0  ;;  %v95_v32 = vld [vmem:[#allocation5 + $0x188] sm:$0xff]  ;;  %v61_v35 = vld [vmem:[#allocation5 + $0x78] sm:$0xff]  ;;  %v42_v53 = vld [vmem:[#allocation2] sm:$0xff] }
  0x2d   :  { %314 = vmatpush.msrb.mxu3 %v173_v63  ;;  %209 = vmatpush.msra.mxu1 %v78_v1  ;;  %v123_v34 = vld [vmem:[#allocation5 + $0x268] sm:$0xff]  ;;  %v93_v36 = vld [vmem:[#allocation5 + $0x178] sm:$0xff] }
  0x2e   :  { %295 = vmatpush.msrb.mxu2 %v139_v2  ;;  %254 = vmatpush.msrb.mxu0 %v77_v3  ;;  %v155_v37 = vld [vmem:[#allocation5 + $0x368] sm:$0xff]  ;;  %v121_v38 = vld [vmem:[#allocation5 + $0x258] sm:$0xff] }
  0x2f   :  { %274 = vmatpush.msrb.mxu1 %v109_v4  ;;  %315 = vmatpush.msrb.mxu3 %v171_v5  ;;  %v59_v39 = vld [vmem:[#allocation5 + $0x68] sm:$0xff]  ;;  %v153_v41 = vld [vmem:[#allocation5 + $0x358] sm:$0xff] }
  0x30   :  { %296 = vmatpush.msrb.mxu2 %v137_v6  ;;  %255 = vmatpush.msrb.mxu0 %v75_v7  ;;  %v91_v40 = vld [vmem:[#allocation5 + $0x168] sm:$0xff]  ;;  %v57_v43 = vld [vmem:[#allocation5 + $0x58] sm:$0xff] }
  0x31   :  { %275 = vmatpush.msrb.mxu1 %v107_v8  ;;  %316 = vmatpush.msrb.mxu3 %v169_v9  ;;  %v119_v42 = vld [vmem:[#allocation5 + $0x248] sm:$0xff]  ;;  %v89_v45 = vld [vmem:[#allocation5 + $0x158] sm:$0xff] }
  0x32   :  { %297 = vmatpush.msrb.mxu2 %v135_v10  ;;  %256 = vmatpush.msrb.mxu0 %v73_v11  ;;  %v117_v46 = vld [vmem:[#allocation5 + $0x238] sm:$0xff]  ;;  %v151_v47 = vld [vmem:[#allocation5 + $0x348] sm:$0xff] }
  0x33   :  { %276 = vmatpush.msrb.mxu1 %v105_v12  ;;  %317 = vmatpush.msrb.mxu3 %v167_v13  ;;  %v45_v48 = vld [vmem:[#allocation2 + $0x18] sm:$0xff]  ;;  %v55_v49 = vld [vmem:[#allocation5 + $0x48] sm:$0xff] }
  0x34   :  { %298 = vmatpush.msrb.mxu2 %v133_v14  ;;  %257 = vmatpush.msrb.mxu0 %v71_v15  ;;  %v87_v50 = vld [vmem:[#allocation5 + $0x148] sm:$0xff]  ;;  %v149_v52 = vld [vmem:[#allocation5 + $0x338] sm:$0xff] }
  0x35   :  { %277 = vmatpush.msrb.mxu1 %v103_v16  ;;  %318 = vmatpush.msrb.mxu3 %v165_v17  ;;  %v115_v51 = vld [vmem:[#allocation5 + $0x228] sm:$0xff]  ;;  %v53_v55 = vld [vmem:[#allocation5 + $0x38] sm:$0xff] }
  0x36   :  { %299 = vmatpush.msrb.mxu2 %v131_v18  ;;  %258 = vmatpush.msrb.mxu0 %v69_v19  ;;  %v43_v54 = vld [vmem:[#allocation2 + $0x8] sm:$0xff]  ;;  %v85_v56 = vld [vmem:[#allocation5 + $0x138] sm:$0xff] }
  0x37   :  { %278 = vmatpush.msrb.mxu1 %v101_v20  ;;  %319 = vmatpush.msrb.mxu3 %v163_v21  ;;  %v113_v57 = vld [vmem:[#allocation5 + $0x218] sm:$0xff]  ;;  %v147_v58 = vld [vmem:[#allocation5 + $0x328] sm:$0xff] }
  0x38   :  { %300 = vmatpush.msrb.mxu2 %v129_v22  ;;  %259 = vmatpush.msrb.mxu0 %v67_v23  ;;  %v51_v59 = vld [vmem:[#allocation5 + $0x28] sm:$0xff]  ;;  %v145_v62 = vld [vmem:[#allocation5 + $0x318] sm:$0xff] }
  0x39   :  { %279 = vmatpush.msrb.mxu1 %v99_v24  ;;  %320 = vmatpush.msrb.mxu3 %v161_v25  ;;  %v83_v60 = vld [vmem:[#allocation5 + $0x128] sm:$0xff]  ;;  %v49_v63 = vld [vmem:[#allocation5 + $0x18] sm:$0xff] }
  0x3a   :  { %301 = vmatpush.msrb.mxu2 %v127_v26  ;;  %260 = vmatpush.msrb.mxu0 %v65_v27  ;;  %v111_v61 = vld [vmem:[#allocation5 + $0x208] sm:$0xff]  ;;  %v81_v0 = vld [vmem:[#allocation5 + $0x118] sm:$0xff] }
  0x3b   :  { %280 = vmatpush.msrb.mxu1 %v97_v28  ;;  %321 = vmatpush.msrb.mxu3 %v159_v29  ;;  %v143_v1 = vld [vmem:[#allocation5 + $0x308] sm:$0xff] }
  0x3c   :  { %302 = vmatpush.msrb.mxu2 %v125_v30  ;;  %261 = vmatpush.msrb.mxu0 %v63_v31  ;;  %v47_v2 = vld [vmem:[#allocation5 + $0x8] sm:$0xff] }
  0x3d   :  { %281 = vmatpush.msrb.mxu1 %v95_v32  ;;  %322 = vmatpush.msrb.mxu3 %v157_v33  ;;  %v79_v3 = vld [vmem:[#allocation5 + $0x108] sm:$0xff] }
  0x3e   :  { %303 = vmatpush.msrb.mxu2 %v123_v34  ;;  %262 = vmatpush.msrb.mxu0 %v61_v35 }
  0x3f   :  { %282 = vmatpush.msrb.mxu1 %v93_v36  ;;  %323 = vmatpush.msrb.mxu3 %v155_v37 }
  0x40   :  { %304 = vmatpush.msrb.mxu2 %v121_v38  ;;  %263 = vmatpush.msrb.mxu0 %v59_v39 }
  0x41   :  { %283 = vmatpush.msrb.mxu1 %v91_v40  ;;  %324 = vmatpush.msrb.mxu3 %v153_v41 }
  0x42   :  { %305 = vmatpush.msrb.mxu2 %v119_v42  ;;  %264 = vmatpush.msrb.mxu0 %v57_v43 }
  0x43   :  { %230 = vmatmul.f32.vlgmr.msra.gmra.mxu2 %v44_v44  ;;  %284 = vmatpush.msrb.mxu1 %v89_v45 }
  0x44   :  { %306 = vmatpush.msrb.mxu2 %v117_v46  ;;  %325 = vmatpush.msrb.mxu3 %v151_v47 }
  0x45   :  { %250 = vmatmul.f32.vlgmr.msra.gmra.mxu3 %v45_v48  ;;  %265 = vmatpush.msrb.mxu0 %v55_v49 }
  0x46   :  { %285 = vmatpush.msrb.mxu1 %v87_v50  ;;  %307 = vmatpush.msrb.mxu2 %v115_v51 }
  0x47   :  { %326 = vmatpush.msrb.mxu3 %v149_v52  ;;  %190 = vmatmul.f32.vlgmr.msra.gmra.mxu0 %v42_v53 }
  0x48   :  { %210 = vmatmul.f32.vlgmr.msra.gmra.mxu1 %v43_v54  ;;  %266 = vmatpush.msrb.mxu0 %v53_v55 }
  0x49   :  { %286 = vmatpush.msrb.mxu1 %v85_v56  ;;  %308 = vmatpush.msrb.mxu2 %v113_v57 }
  0x4a   :  { %327 = vmatpush.msrb.mxu3 %v147_v58  ;;  %267 = vmatpush.msrb.mxu0 %v51_v59 }
  0x4b   :  { %287 = vmatpush.msrb.mxu1 %v83_v60  ;;  %309 = vmatpush.msrb.mxu2 %v111_v61 }
  0x4c   :  { %328 = vmatpush.msrb.mxu3 %v145_v62  ;;  %310 = vmatmul.f32.vlgmr.msrb.gmra.mxu2 %v44_v44 }
  0x4d   :  { %268 = vmatpush.msrb.mxu0 %v49_v63  ;;  %288 = vmatpush.msrb.mxu1 %v81_v0 }
  0x4e   :  { %329 = vmatpush.msrb.mxu3 %v143_v1 }
  0x4f   :  { %330 = vmatmul.f32.vlgmr.msrb.gmra.mxu3 %v45_v48  ;;  %269 = vmatpush.msrb.mxu0 %v47_v2 }
  0x50   :  { %289 = vmatpush.msrb.mxu1 %v79_v3  ;;  %270 = vmatmul.f32.vlgmr.msrb.gmra.mxu0 %v42_v53 }
  0x51   :  { %290 = vmatmul.f32.vlgmr.msrb.gmra.mxu1 %v43_v54 }
  0xc4   :  { %v191_v4 = vpop.f32.mrf.mxu0 }
  0xc5   :  { %v211_v5 = vpop.f32.mrf.mxu1 }
  0xc6   :  { %v212_v6 = vadd.f32 %v211_v5, %v191_v4  ;;  %v231_v7 = vpop.f32.mrf.mxu2 }
  0xc8   :  { %v232_v8 = vadd.f32 %v231_v7, %v212_v6  ;;  %v251_v9 = vpop.f32.mrf.mxu3 }
  0xca   :  { %v252_v10 = vadd.f32 %v251_v9, %v232_v8 }
  0xcc   :  { %334 = vst [vmem:[#allocation7] sm:$0xff] %v252_v10 }
  0xcd   :  { %v271_v11 = vpop.f32.mrf.mxu0 }
  0xce   :  { %v291_v12 = vpop.f32.mrf.mxu1 }
  0xcf   :  { %v292_v13 = vadd.f32 %v291_v12, %v271_v11  ;;  %v311_v14 = vpop.f32.mrf.mxu2 }
  0xd1   :  { %v312_v15 = vadd.f32 %v311_v14, %v292_v13 }
  0xd2   :  { %v331_v16 = vpop.f32.mrf.mxu3 }
  0xd3   :  { %v332_v17 = vadd.f32 %v331_v16, %v312_v15 }
  0xd5   :  { %335 = vst [vmem:[#allocation7 + $0x8] sm:$0xff] %v332_v17 }
  0xd6   :  { %346 = dma.vmem_to_hbm [thread:$0]  %s342_s1, 256, %s344_s23, [#allocation4]  }
  0xd7   :  { %435 = dma.done.wait [#allocation4], 256  }
  0xd8   :  { %436 = vsyncadd [#allocation4], 4294967040 }
  0xd9   :  { %351 = vsyncpa [#allocation3], 1 }
  0xda   :  { %352 = vsyncpa [#allocation6], 1 }
  0xdb   :  { %353 = vsyncpa [#allocation4], 1 }

// kernel: tpu_custom_call.1
= control target key start
LH: loop header
LB: loop body
LE: loop exit
PB: predicated region body
PF: predicated region fallthrough
CT: control target
= control target key end

     0   :  { %7 = vsyncpa [#allocation3], 0  ;;  %s466_s0 = inlined_call_operand.hbm [shape: f32[8,512], index: 0, kind: input, shape index: {}]   ;;  %s467_s1 = inlined_call_operand.hbm [shape: f32[512,256], index: 1, kind: input, shape index: {}]   ;;  %s468_s2 = inlined_call_operand.hbm [shape: f32[8,256], index: 2, kind: output, shape index: {}]  }
   0x1   :  { %8 = vsyncpa [#allocation6], 0 }
   0x2   :  { %9 = vsyncpa [#allocation4], 0  ;;  %s15_s11 = sshll.u32 %s466_s0, 4  ;;  %s437_s12 = smov [#allocation2]   ;;  %s16_s11 = int_to_ptr.hbm [resolvable:$true] %s15_s11 }
   0x3   :  { %s17_s13 = sshll.u32 %s437_s12, 4  ;;  %s25_s16 = sshll.u32 %s467_s1, 4  ;;  %s18_s13 = int_to_ptr.vmem [resolvable:$true] %s17_s13  ;;  %s26_s16 = int_to_ptr.hbm [resolvable:$true] %s25_s16 }
   0x4   :  { %20 = dma.hbm_to_vmem [thread:$0]  %s16_s11, 512, %s18_s13, [#allocation3]  }
   0x5   :  { %s438_s17 = smov [#allocation5]   ;;  %s439_s19 = smov 256  }
   0x6   :  { %s27_s18 = sshll.u32 %s438_s17, 4  ;;  %s440_s20 = smov 16   ;;  %s28_s18 = int_to_ptr.vmem [resolvable:$true] %s27_s18 }
   0x7   :  { %33 = dma.hbm_to_vmem [thread:$0]  %s26_s16, 16384, %s28_s18, [#allocation6], %s439_s19, %s439_s19, %s440_s20  }
   0x8   :  { %431 = dma.done.wait [#allocation3], 512  }
   0x9   :  { %432 = vsyncadd [#allocation3], 4294966784 }
   0xa   :  { %433 = dma.done.wait [#allocation6], 16384  }
   0xb   :  { %434 = vsyncadd [#allocation6], 4294950912  ;;  %v140_v0 = vld [vmem:[#allocation5 + $0x2f0] sm:$0xff]  ;;  %v138_v1 = vld [vmem:[#allocation5 + $0x2e0] sm:$0xff]  ;;  %s441_s0 = smov [#allocation7]   ;;  %s343_s23 = sshll.u32 %s468_s2, 4  ;;  %s344_s23 = int_to_ptr.hbm [resolvable:$true] %s343_s23 }
   0xc   :  { %v172_v2 = vld [vmem:[#allocation5 + $0x3f0] sm:$0xff]  ;;  %214 = vmatpush.msra.mxu2 %v140_v0  ;;  %v170_v6 = vld [vmem:[#allocation5 + $0x3e0] sm:$0xff]  ;;  %v141_v62 = vld [vmem:[#allocation5 + $0x2f8] sm:$0xff]  ;;  %s341_s1 = sshll.u32 %s441_s0, 4  ;;  %s342_s1 = int_to_ptr.vmem [resolvable:$true] %s341_s1 }
   0xd   :  { %234 = vmatpush.msra.mxu3 %v172_v2  ;;  %v76_v3 = vld [vmem:[#allocation5 + $0xf0] sm:$0xff]  ;;  %v74_v7 = vld [vmem:[#allocation5 + $0xe0] sm:$0xff]  ;;  %v173_v63 = vld [vmem:[#allocation5 + $0x3f8] sm:$0xff] }
   0xe   :  { %v108_v4 = vld [vmem:[#allocation5 + $0x1f0] sm:$0xff]  ;;  %174 = vmatpush.msra.mxu0 %v76_v3  ;;  %v106_v8 = vld [vmem:[#allocation5 + $0x1e0] sm:$0xff]  ;;  %215 = vmatpush.msra.mxu2 %v138_v1  ;;  %v139_v2 = vld [vmem:[#allocation5 + $0x2e8] sm:$0xff] }
   0xf   :  { %v136_v5 = vld [vmem:[#allocation5 + $0x2d0] sm:$0xff]  ;;  %194 = vmatpush.msra.mxu1 %v108_v4  ;;  %235 = vmatpush.msra.mxu3 %v170_v6  ;;  %v134_v11 = vld [vmem:[#allocation5 + $0x2c0] sm:$0xff]  ;;  %v77_v3 = vld [vmem:[#allocation5 + $0xf8] sm:$0xff] }
  0x10   :  { %v168_v9 = vld [vmem:[#allocation5 + $0x3d0] sm:$0xff]  ;;  %175 = vmatpush.msra.mxu0 %v74_v7  ;;  %v166_v13 = vld [vmem:[#allocation5 + $0x3c0] sm:$0xff]  ;;  %216 = vmatpush.msra.mxu2 %v136_v5  ;;  %v109_v4 = vld [vmem:[#allocation5 + $0x1f8] sm:$0xff] }
  0x11   :  { %v72_v10 = vld [vmem:[#allocation5 + $0xd0] sm:$0xff]  ;;  %195 = vmatpush.msra.mxu1 %v106_v8  ;;  %236 = vmatpush.msra.mxu3 %v168_v9  ;;  %v70_v14 = vld [vmem:[#allocation5 + $0xc0] sm:$0xff]  ;;  %v171_v5 = vld [vmem:[#allocation5 + $0x3e8] sm:$0xff] }
  0x12   :  { %v104_v12 = vld [vmem:[#allocation5 + $0x1d0] sm:$0xff]  ;;  %v102_v15 = vld [vmem:[#allocation5 + $0x1c0] sm:$0xff]  ;;  %176 = vmatpush.msra.mxu0 %v72_v10  ;;  %217 = vmatpush.msra.mxu2 %v134_v11  ;;  %v137_v6 = vld [vmem:[#allocation5 + $0x2d8] sm:$0xff] }
  0x13   :  { %196 = vmatpush.msra.mxu1 %v104_v12  ;;  %v132_v16 = vld [vmem:[#allocation5 + $0x2b0] sm:$0xff]  ;;  %237 = vmatpush.msra.mxu3 %v166_v13  ;;  %v130_v20 = vld [vmem:[#allocation5 + $0x2a0] sm:$0xff]  ;;  %v75_v7 = vld [vmem:[#allocation5 + $0xe8] sm:$0xff] }
  0x14   :  { %v164_v17 = vld [vmem:[#allocation5 + $0x3b0] sm:$0xff]  ;;  %177 = vmatpush.msra.mxu0 %v70_v14  ;;  %v162_v21 = vld [vmem:[#allocation5 + $0x3a0] sm:$0xff]  ;;  %218 = vmatpush.msra.mxu2 %v132_v16  ;;  %v107_v8 = vld [vmem:[#allocation5 + $0x1e8] sm:$0xff] }
  0x15   :  { %v68_v18 = vld [vmem:[#allocation5 + $0xb0] sm:$0xff]  ;;  %197 = vmatpush.msra.mxu1 %v102_v15  ;;  %238 = vmatpush.msra.mxu3 %v164_v17  ;;  %v66_v22 = vld [vmem:[#allocation5 + $0xa0] sm:$0xff]  ;;  %v169_v9 = vld [vmem:[#allocation5 + $0x3d8] sm:$0xff] }
  0x16   :  { %v100_v19 = vld [vmem:[#allocation5 + $0x1b0] sm:$0xff]  ;;  %v98_v23 = vld [vmem:[#allocation5 + $0x1a0] sm:$0xff]  ;;  %178 = vmatpush.msra.mxu0 %v68_v18  ;;  %219 = vmatpush.msra.mxu2 %v130_v20  ;;  %v135_v10 = vld [vmem:[#allocation5 + $0x2c8] sm:$0xff] }
  0x17   :  { %198 = vmatpush.msra.mxu1 %v100_v19  ;;  %v128_v24 = vld [vmem:[#allocation5 + $0x290] sm:$0xff]  ;;  %239 = vmatpush.msra.mxu3 %v162_v21  ;;  %v126_v28 = vld [vmem:[#allocation5 + $0x280] sm:$0xff]  ;;  %v73_v11 = vld [vmem:[#allocation5 + $0xd8] sm:$0xff] }
  0x18   :  { %v160_v25 = vld [vmem:[#allocation5 + $0x390] sm:$0xff]  ;;  %179 = vmatpush.msra.mxu0 %v66_v22  ;;  %v158_v29 = vld [vmem:[#allocation5 + $0x380] sm:$0xff]  ;;  %220 = vmatpush.msra.mxu2 %v128_v24  ;;  %v105_v12 = vld [vmem:[#allocation5 + $0x1d8] sm:$0xff] }
  0x19   :  { %v64_v26 = vld [vmem:[#allocation5 + $0x90] sm:$0xff]  ;;  %199 = vmatpush.msra.mxu1 %v98_v23  ;;  %240 = vmatpush.msra.mxu3 %v160_v25  ;;  %v62_v30 = vld [vmem:[#allocation5 + $0x80] sm:$0xff]  ;;  %v167_v13 = vld [vmem:[#allocation5 + $0x3c8] sm:$0xff] }
  0x1a   :  { %v96_v27 = vld [vmem:[#allocation5 + $0x190] sm:$0xff]  ;;  %v94_v31 = vld [vmem:[#allocation5 + $0x180] sm:$0xff]  ;;  %180 = vmatpush.msra.mxu0 %v64_v26  ;;  %221 = vmatpush.msra.mxu2 %v126_v28  ;;  %v133_v14 = vld [vmem:[#allocation5 + $0x2b8] sm:$0xff] }
  0x1b   :  { %200 = vmatpush.msra.mxu1 %v96_v27  ;;  %v124_v32 = vld [vmem:[#allocation5 + $0x270] sm:$0xff]  ;;  %241 = vmatpush.msra.mxu3 %v158_v29  ;;  %v122_v36 = vld [vmem:[#allocation5 + $0x260] sm:$0xff]  ;;  %v71_v15 = vld [vmem:[#allocation5 + $0xc8] sm:$0xff] }
  0x1c   :  { %v156_v33 = vld [vmem:[#allocation5 + $0x370] sm:$0xff]  ;;  %181 = vmatpush.msra.mxu0 %v62_v30  ;;  %v154_v37 = vld [vmem:[#allocation5 + $0x360] sm:$0xff]  ;;  %222 = vmatpush.msra.mxu2 %v124_v32  ;;  %v103_v16 = vld [vmem:[#allocation5 + $0x1c8] sm:$0xff] }
  0x1d   :  { %v60_v34 = vld [vmem:[#allocation5 + $0x70] sm:$0xff]  ;;  %201 = vmatpush.msra.mxu1 %v94_v31  ;;  %242 = vmatpush.msra.mxu3 %v156_v33  ;;  %v58_v38 = vld [vmem:[#allocation5 + $0x60] sm:$0xff]  ;;  %v165_v17 = vld [vmem:[#allocation5 + $0x3b8] sm:$0xff] }
  0x1e   :  { %v92_v35 = vld [vmem:[#allocation5 + $0x170] sm:$0xff]  ;;  %v90_v39 = vld [vmem:[#allocation5 + $0x160] sm:$0xff]  ;;  %182 = vmatpush.msra.mxu0 %v60_v34  ;;  %223 = vmatpush.msra.mxu2 %v122_v36  ;;  %v131_v18 = vld [vmem:[#allocation5 + $0x2a8] sm:$0xff] }
  0x1f   :  { %202 = vmatpush.msra.mxu1 %v92_v35  ;;  %v120_v40 = vld [vmem:[#allocation5 + $0x250] sm:$0xff]  ;;  %243 = vmatpush.msra.mxu3 %v154_v37  ;;  %v118_v44 = vld [vmem:[#allocation5 + $0x240] sm:$0xff]  ;;  %v69_v19 = vld [vmem:[#allocation5 + $0xb8] sm:$0xff] }
  0x20   :  { %v152_v41 = vld [vmem:[#allocation5 + $0x350] sm:$0xff]  ;;  %183 = vmatpush.msra.mxu0 %v58_v38  ;;  %v150_v45 = vld [vmem:[#allocation5 + $0x340] sm:$0xff]  ;;  %224 = vmatpush.msra.mxu2 %v120_v40  ;;  %v101_v20 = vld [vmem:[#allocation5 + $0x1b8] sm:$0xff] }
  0x21   :  { %v56_v42 = vld [vmem:[#allocation5 + $0x50] sm:$0xff]  ;;  %203 = vmatpush.msra.mxu1 %v90_v39  ;;  %244 = vmatpush.msra.mxu3 %v152_v41  ;;  %v54_v46 = vld [vmem:[#allocation5 + $0x40] sm:$0xff]  ;;  %v163_v21 = vld [vmem:[#allocation5 + $0x3a8] sm:$0xff] }
  0x22   :  { %v88_v43 = vld [vmem:[#allocation5 + $0x150] sm:$0xff]  ;;  %v86_v47 = vld [vmem:[#allocation5 + $0x140] sm:$0xff]  ;;  %184 = vmatpush.msra.mxu0 %v56_v42  ;;  %225 = vmatpush.msra.mxu2 %v118_v44  ;;  %v129_v22 = vld [vmem:[#allocation5 + $0x298] sm:$0xff] }
  0x23   :  { %204 = vmatpush.msra.mxu1 %v88_v43  ;;  %v116_v48 = vld [vmem:[#allocation5 + $0x230] sm:$0xff]  ;;  %245 = vmatpush.msra.mxu3 %v150_v45  ;;  %v114_v52 = vld [vmem:[#allocation5 + $0x220] sm:$0xff]  ;;  %v67_v23 = vld [vmem:[#allocation5 + $0xa8] sm:$0xff] }
  0x24   :  { %v148_v49 = vld [vmem:[#allocation5 + $0x330] sm:$0xff]  ;;  %185 = vmatpush.msra.mxu0 %v54_v46  ;;  %v146_v53 = vld [vmem:[#allocation5 + $0x320] sm:$0xff]  ;;  %226 = vmatpush.msra.mxu2 %v116_v48  ;;  %v99_v24 = vld [vmem:[#allocation5 + $0x1a8] sm:$0xff] }
  0x25   :  { %v52_v50 = vld [vmem:[#allocation5 + $0x30] sm:$0xff]  ;;  %205 = vmatpush.msra.mxu1 %v86_v47  ;;  %246 = vmatpush.msra.mxu3 %v148_v49  ;;  %v50_v54 = vld [vmem:[#allocation5 + $0x20] sm:$0xff]  ;;  %v161_v25 = vld [vmem:[#allocation5 + $0x398] sm:$0xff] }
  0x26   :  { %v84_v51 = vld [vmem:[#allocation5 + $0x130] sm:$0xff]  ;;  %v82_v55 = vld [vmem:[#allocation5 + $0x120] sm:$0xff]  ;;  %186 = vmatpush.msra.mxu0 %v52_v50  ;;  %227 = vmatpush.msra.mxu2 %v114_v52  ;;  %v127_v26 = vld [vmem:[#allocation5 + $0x288] sm:$0xff] }
  0x27   :  { %206 = vmatpush.msra.mxu1 %v84_v51  ;;  %v112_v56 = vld [vmem:[#allocation5 + $0x210] sm:$0xff]  ;;  %247 = vmatpush.msra.mxu3 %v146_v53  ;;  %v110_v60 = vld [vmem:[#allocation5 + $0x200] sm:$0xff]  ;;  %v65_v27 = vld [vmem:[#allocation5 + $0x98] sm:$0xff] }
  0x28   :  { %v144_v57 = vld [vmem:[#allocation5 + $0x310] sm:$0xff]  ;;  %187 = vmatpush.msra.mxu0 %v50_v54  ;;  %v142_v61 = vld [vmem:[#allocation5 + $0x300] sm:$0xff]  ;;  %228 = vmatpush.msra.mxu2 %v112_v56  ;;  %v97_v28 = vld [vmem:[#allocation5 + $0x198] sm:$0xff] }
  0x29   :  { %v48_v58 = vld [vmem:[#allocation5 + $0x10] sm:$0xff]  ;;  %207 = vmatpush.msra.mxu1 %v82_v55  ;;  %248 = vmatpush.msra.mxu3 %v144_v57  ;;  %v46_v0 = vld [vmem:[#allocation5] sm:$0xff]  ;;  %v159_v29 = vld [vmem:[#allocation5 + $0x388] sm:$0xff] }
  0x2a   :  { %v80_v59 = vld [vmem:[#allocation5 + $0x110] sm:$0xff]  ;;  %188 = vmatpush.msra.mxu0 %v48_v58  ;;  %v78_v1 = vld [vmem:[#allocation5 + $0x100] sm:$0xff]  ;;  %229 = vmatpush.msra.mxu2 %v110_v60  ;;  %v125_v30 = vld [vmem:[#allocation5 + $0x278] sm:$0xff] }
  0x2b   :  { %208 = vmatpush.msra.mxu1 %v80_v59  ;;  %249 = vmatpush.msra.mxu3 %v142_v61  ;;  %v63_v31 = vld [vmem:[#allocation5 + $0x88] sm:$0xff]  ;;  %v157_v33 = vld [vmem:[#allocation5 + $0x378] sm:$0xff]  ;;  %v44_v44 = vld [vmem:[#allocation2 + $0x10] sm:$0xff] }
  0x2c   :  { %294 = vmatpush.msrb.mxu2 %v141_v62  ;;  %189 = vmatpush.msra.mxu0 %v46_v0  ;;  %v95_v32 = vld [vmem:[#allocation5 + $0x188] sm:$0xff]  ;;  %v61_v35 = vld [vmem:[#allocation5 + $0x78] sm:$0xff]  ;;  %v42_v53 = vld [vmem:[#allocation2] sm:$0xff] }
  0x2d   :  { %314 = vmatpush.msrb.mxu3 %v173_v63  ;;  %209 = vmatpush.msra.mxu1 %v78_v1  ;;  %v123_v34 = vld [vmem:[#allocation5 + $0x268] sm:$0xff]  ;;  %v93_v36 = vld [vmem:[#allocation5 + $0x178] sm:$0xff] }
  0x2e   :  { %295 = vmatpush.msrb.mxu2 %v139_v2  ;;  %254 = vmatpush.msrb.mxu0 %v77_v3  ;;  %v155_v37 = vld [vmem:[#allocation5 + $0x368] sm:$0xff]  ;;  %v121_v38 = vld [vmem:[#allocation5 + $0x258] sm:$0xff] }
  0x2f   :  { %274 = vmatpush.msrb.mxu1 %v109_v4  ;;  %315 = vmatpush.msrb.mxu3 %v171_v5  ;;  %v59_v39 = vld [vmem:[#allocation5 + $0x68] sm:$0xff]  ;;  %v153_v41 = vld [vmem:[#allocation5 + $0x358] sm:$0xff] }
  0x30   :  { %296 = vmatpush.msrb.mxu2 %v137_v6  ;;  %255 = vmatpush.msrb.mxu0 %v75_v7  ;;  %v91_v40 = vld [vmem:[#allocation5 + $0x168] sm:$0xff]  ;;  %v57_v43 = vld [vmem:[#allocation5 + $0x58] sm:$0xff] }
  0x31   :  { %275 = vmatpush.msrb.mxu1 %v107_v8  ;;  %316 = vmatpush.msrb.mxu3 %v169_v9  ;;  %v119_v42 = vld [vmem:[#allocation5 + $0x248] sm:$0xff]  ;;  %v89_v45 = vld [vmem:[#allocation5 + $0x158] sm:$0xff] }
  0x32   :  { %297 = vmatpush.msrb.mxu2 %v135_v10  ;;  %256 = vmatpush.msrb.mxu0 %v73_v11  ;;  %v117_v46 = vld [vmem:[#allocation5 + $0x238] sm:$0xff]  ;;  %v151_v47 = vld [vmem:[#allocation5 + $0x348] sm:$0xff] }
  0x33   :  { %276 = vmatpush.msrb.mxu1 %v105_v12  ;;  %317 = vmatpush.msrb.mxu3 %v167_v13  ;;  %v45_v48 = vld [vmem:[#allocation2 + $0x18] sm:$0xff]  ;;  %v55_v49 = vld [vmem:[#allocation5 + $0x48] sm:$0xff] }
  0x34   :  { %298 = vmatpush.msrb.mxu2 %v133_v14  ;;  %257 = vmatpush.msrb.mxu0 %v71_v15  ;;  %v87_v50 = vld [vmem:[#allocation5 + $0x148] sm:$0xff]  ;;  %v149_v52 = vld [vmem:[#allocation5 + $0x338] sm:$0xff] }
  0x35   :  { %277 = vmatpush.msrb.mxu1 %v103_v16  ;;  %318 = vmatpush.msrb.mxu3 %v165_v17  ;;  %v115_v51 = vld [vmem:[#allocation5 + $0x228] sm:$0xff]  ;;  %v53_v55 = vld [vmem:[#allocation5 + $0x38] sm:$0xff] }
  0x36   :  { %299 = vmatpush.msrb.mxu2 %v131_v18  ;;  %258 = vmatpush.msrb.mxu0 %v69_v19  ;;  %v43_v54 = vld [vmem:[#allocation2 + $0x8] sm:$0xff]  ;;  %v85_v56 = vld [vmem:[#allocation5 + $0x138] sm:$0xff] }
  0x37   :  { %278 = vmatpush.msrb.mxu1 %v101_v20  ;;  %319 = vmatpush.msrb.mxu3 %v163_v21  ;;  %v113_v57 = vld [vmem:[#allocation5 + $0x218] sm:$0xff]  ;;  %v147_v58 = vld [vmem:[#allocation5 + $0x328] sm:$0xff] }
  0x38   :  { %300 = vmatpush.msrb.mxu2 %v129_v22  ;;  %259 = vmatpush.msrb.mxu0 %v67_v23  ;;  %v51_v59 = vld [vmem:[#allocation5 + $0x28] sm:$0xff]  ;;  %v145_v62 = vld [vmem:[#allocation5 + $0x318] sm:$0xff] }
  0x39   :  { %279 = vmatpush.msrb.mxu1 %v99_v24  ;;  %320 = vmatpush.msrb.mxu3 %v161_v25  ;;  %v83_v60 = vld [vmem:[#allocation5 + $0x128] sm:$0xff]  ;;  %v49_v63 = vld [vmem:[#allocation5 + $0x18] sm:$0xff] }
  0x3a   :  { %301 = vmatpush.msrb.mxu2 %v127_v26  ;;  %260 = vmatpush.msrb.mxu0 %v65_v27  ;;  %v111_v61 = vld [vmem:[#allocation5 + $0x208] sm:$0xff]  ;;  %v81_v0 = vld [vmem:[#allocation5 + $0x118] sm:$0xff] }
  0x3b   :  { %280 = vmatpush.msrb.mxu1 %v97_v28  ;;  %321 = vmatpush.msrb.mxu3 %v159_v29  ;;  %v143_v1 = vld [vmem:[#allocation5 + $0x308] sm:$0xff] }
  0x3c   :  { %302 = vmatpush.msrb.mxu2 %v125_v30  ;;  %261 = vmatpush.msrb.mxu0 %v63_v31  ;;  %v47_v2 = vld [vmem:[#allocation5 + $0x8] sm:$0xff] }
  0x3d   :  { %281 = vmatpush.msrb.mxu1 %v95_v32  ;;  %322 = vmatpush.msrb.mxu3 %v157_v33  ;;  %v79_v3 = vld [vmem:[#allocation5 + $0x108] sm:$0xff] }
  0x3e   :  { %303 = vmatpush.msrb.mxu2 %v123_v34  ;;  %262 = vmatpush.msrb.mxu0 %v61_v35 }
  0x3f   :  { %282 = vmatpush.msrb.mxu1 %v93_v36  ;;  %323 = vmatpush.msrb.mxu3 %v155_v37 }
  0x40   :  { %304 = vmatpush.msrb.mxu2 %v121_v38  ;;  %263 = vmatpush.msrb.mxu0 %v59_v39 }
  0x41   :  { %283 = vmatpush.msrb.mxu1 %v91_v40  ;;  %324 = vmatpush.msrb.mxu3 %v153_v41 }
  0x42   :  { %305 = vmatpush.msrb.mxu2 %v119_v42  ;;  %264 = vmatpush.msrb.mxu0 %v57_v43 }
  0x43   :  { %230 = vmatmul.f32.vlgmr.msra.gmra.mxu2 %v44_v44  ;;  %284 = vmatpush.msrb.mxu1 %v89_v45 }
  0x44   :  { %306 = vmatpush.msrb.mxu2 %v117_v46  ;;  %325 = vmatpush.msrb.mxu3 %v151_v47 }
  0x45   :  { %250 = vmatmul.f32.vlgmr.msra.gmra.mxu3 %v45_v48  ;;  %265 = vmatpush.msrb.mxu0 %v55_v49 }
  0x46   :  { %285 = vmatpush.msrb.mxu1 %v87_v50  ;;  %307 = vmatpush.msrb.mxu2 %v115_v51 }
  0x47   :  { %326 = vmatpush.msrb.mxu3 %v149_v52  ;;  %190 = vmatmul.f32.vlgmr.msra.gmra.mxu0 %v42_v53 }
  0x48   :  { %210 = vmatmul.f32.vlgmr.msra.gmra.mxu1 %v43_v54  ;;  %266 = vmatpush.msrb.mxu0 %v53_v55 }
  0x49   :  { %286 = vmatpush.msrb.mxu1 %v85_v56  ;;  %308 = vmatpush.msrb.mxu2 %v113_v57 }
  0x4a   :  { %327 = vmatpush.msrb.mxu3 %v147_v58  ;;  %267 = vmatpush.msrb.mxu0 %v51_v59 }
  0x4b   :  { %287 = vmatpush.msrb.mxu1 %v83_v60  ;;  %309 = vmatpush.msrb.mxu2 %v111_v61 }
  0x4c   :  { %328 = vmatpush.msrb.mxu3 %v145_v62  ;;  %310 = vmatmul.f32.vlgmr.msrb.gmra.mxu2 %v44_v44 }
  0x4d   :  { %268 = vmatpush.msrb.mxu0 %v49_v63  ;;  %288 = vmatpush.msrb.mxu1 %v81_v0 }
  0x4e   :  { %329 = vmatpush.msrb.mxu3 %v143_v1 }
  0x4f   :  { %330 = vmatmul.f32.vlgmr.msrb.gmra.mxu3 %v45_v48  ;;  %269 = vmatpush.msrb.mxu0 %v47_v2 }
  0x50   :  { %289 = vmatpush.msrb.mxu1 %v79_v3  ;;  %270 = vmatmul.f32.vlgmr.msrb.gmra.mxu0 %v42_v53 }
  0x51   :  { %290 = vmatmul.f32.vlgmr.msrb.gmra.mxu1 %v43_v54 }
  0xc4   :  { %v191_v4 = vpop.f32.mrf.mxu0 }
  0xc5   :  { %v211_v5 = vpop.f32.mrf.mxu1 }
  0xc6   :  { %v212_v6 = vadd.f32 %v211_v5, %v191_v4  ;;  %v231_v7 = vpop.f32.mrf.mxu2 }
  0xc8   :  { %v232_v8 = vadd.f32 %v231_v7, %v212_v6  ;;  %v251_v9 = vpop.f32.mrf.mxu3 }
  0xca   :  { %v252_v10 = vadd.f32 %v251_v9, %v232_v8 }
  0xcc   :  { %334 = vst [vmem:[#allocation7] sm:$0xff] %v252_v10 }
  0xcd   :  { %v271_v11 = vpop.f32.mrf.mxu0 }
  0xce   :  { %v291_v12 = vpop.f32.mrf.mxu1 }
  0xcf   :  { %v292_v13 = vadd.f32 %v291_v12, %v271_v11  ;;  %v311_v14 = vpop.f32.mrf.mxu2 }
  0xd1   :  { %v312_v15 = vadd.f32 %v311_v14, %v292_v13 }
  0xd2   :  { %v331_v16 = vpop.f32.mrf.mxu3 }
  0xd3   :  { %v332_v17 = vadd.f32 %v331_v16, %v312_v15 }
  0xd5   :  { %335 = vst [vmem:[#allocation7 + $0x8] sm:$0xff] %v332_v17 }
  0xd6   :  { %346 = dma.vmem_to_hbm [thread:$0]  %s342_s1, 256, %s344_s23, [#allocation4]  }
  0xd7   :  { %435 = dma.done.wait [#allocation4], 256  }
  0xd8   :  { %436 = vsyncadd [#allocation4], 4294967040 }
  0xd9   :  { %351 = vsyncpa [#allocation3], 1 }
  0xda   :  { %352 = vsyncpa [#allocation6], 1 }
  0xdb   :  { %353 = vsyncpa [#allocation4], 1 }

</bundles_post_ra>
